<compile_context>
chip_gen: v7x
topology: tpu7x:2x2x1
jax: 0.10.0
libtpu: 0.0.40
codegen_flags: <defaults>
</compile_context>

<pallas_src>
import jax
import jax.numpy as jnp
from jax.experimental import pallas as pl
from jax.experimental.pallas import tpu as pltpu


def _round_up(n, m):
    return ((n + m - 1) // m) * m


def valuenet_kernel(x_ref, p1_ref, p2_ref, o_ref):
    x = x_ref[...]                      # (TB, S) f32
    s = x.shape[1]                      # static state_dim

    # fc1 on the VPU: K is tiny (4 for CartPole), so an unrolled
    # broadcast-mul + add chain beats an MXU pass (no systolic push / MRF pop).
    b1 = p1_ref[s:s + 1, :]             # (1, H)   bias row of the packed slab
    h = b1 + x[:, 0:1] * p1_ref[0:1, :]
    for k in range(1, s):               # static unroll over state_dim
        h = h + x[:, k:k + 1] * p1_ref[k:k + 1, :]

    # ReLU
    h = jnp.maximum(h, 0.0)             # (TB, H)

    # fc2 on VPU + XLU lane reduce: an N=1 MXU output would waste a whole
    # systolic round-trip for one result lane.
    w2 = p2_ref[0:1, :]                 # (1, H)
    b2 = p2_ref[1:2, 0:1]               # (1, 1)
    v = jnp.sum(h * w2, axis=-1, keepdims=True) + b2
    o_ref[...] = v.astype(o_ref.dtype)


def value_net_forward(x, p1, p2):
    """x: (B, state_dim) f32; p1: (state_dim+1, H); p2: (2, H). Returns (B, 1) f32."""
    B, S = x.shape
    H = p1.shape[1]

    # Batch tile: multiple of 8 sublanes, capped at 512 rows per block.
    TB = min(512, _round_up(max(B, 1), 8))
    Bp = _round_up(B, TB)
    if Bp != B:
        x = jnp.pad(x, ((0, Bp - B), (0, 0)))   # zero-pad; junk rows sliced off below

    out = pl.pallas_call(
        valuenet_kernel,
        out_shape=jax.ShapeDtypeStruct((Bp, 1), jnp.float32),
        grid=(Bp // TB,),
        in_specs=[
            pl.BlockSpec((TB, S), lambda i: (i, 0)),      # batch-tiled activations
            pl.BlockSpec((S + 1, H), lambda i: (0, 0)),   # packed [w1; b1], resident
            pl.BlockSpec((2, H), lambda i: (0, 0)),       # packed [w2_row; b2_row], resident
        ],
        out_specs=pl.BlockSpec((TB, 1), lambda i: (i, 0)),
        compiler_params=pltpu.CompilerParams(
            dimension_semantics=("parallel",),            # v7x: 2 TCs split the batch
        ),
    )(x, p1, p2)
    return out[:B] if Bp != B else out


def init_value_net_params(key, state_dim, hidden_dim):
    """torch.nn.Linear-style init (uniform(-1/sqrt(fan_in), 1/sqrt(fan_in))),
    returned both as raw tensors (for the reference) and as packed slabs."""
    k1, k2, k3, k4 = jax.random.split(key, 4)
    bound1 = 1.0 / jnp.sqrt(jnp.float32(state_dim))
    bound2 = 1.0 / jnp.sqrt(jnp.float32(hidden_dim))
    w1 = jax.random.uniform(k1, (state_dim, hidden_dim), jnp.float32, -bound1, bound1)
    b1 = jax.random.uniform(k2, (1, hidden_dim), jnp.float32, -bound1, bound1)
    w2 = jax.random.uniform(k3, (1, hidden_dim), jnp.float32, -bound2, bound2)  # fc2.weight row
    b2 = jax.random.uniform(k4, (1, 1), jnp.float32, -bound2, bound2)

    # Packed slabs: fewer kernel operands -> fewer per-launch DMAs.
    p1 = jnp.concatenate([w1, b1], axis=0)                       # (S+1, H)
    b2_row = jnp.zeros((1, hidden_dim), jnp.float32).at[0, 0].set(b2[0, 0])
    p2 = jnp.concatenate([w2, b2_row], axis=0)                   # (2, H)
    return (p1, p2), (w1, b1, w2, b2)


if __name__ == "__main__":
    # CartPole-v0: state_dim = 4; hidden_dim = 128 as in the original script.
    batch = 2
    state_dim = 4
    hidden_dim = 128

    key = jax.random.PRNGKey(0)
    k_params, k_x, k_big = jax.random.split(key, 3)

    (p1, p2), (w1, b1, w2, b2) = init_value_net_params(k_params, state_dim, hidden_dim)

    def ref_forward(xs):
        return jnp.maximum(xs @ w1 + b1, 0.0) @ w2.T + b2

    # Small-batch check (matches the demo shape).
    x = jax.random.normal(k_x, (batch, state_dim), jnp.float32)
    out = value_net_forward(x, p1, p2)
    jax.block_until_ready(out)
    assert out.shape == (batch, 1)
    assert jnp.allclose(out, ref_forward(x), atol=1e-5, rtol=1e-5)

    # Larger PPO-minibatch-sized check: exercises the batch grid + padding path.
    x_big = jax.random.normal(k_big, (1000, state_dim), jnp.float32)
    out_big = value_net_forward(x_big, p1, p2)
    jax.block_until_ready(out_big)
    assert out_big.shape == (1000, 1)
    assert jnp.allclose(out_big, ref_forward(x_big), atol=1e-4, rtol=1e-4)

    print("KERNEL_OK")
</pallas_src>

<mosaic_0001>
module attributes {stable_mosaic.version = 11 : i64} {
  func.func @valuenet_kernel(%arg0: i32, %arg1: memref<8x4xf32, #tpu.memory_space<vmem>>, %arg2: memref<5x128xf32, #tpu.memory_space<vmem>>, %arg3: memref<2x128xf32, #tpu.memory_space<vmem>>, %arg4: memref<8x1xf32, #tpu.memory_space<vmem>>) attributes {dimension_semantics = [#tpu.dimension_semantics<parallel>], iteration_bounds = array<i64: 1>, scalar_prefetch = 0 : i64, scratch_operands = 0 : i64, tpu.core_type = #tpu.core_type<tc>, window_params = [{transform_indices = @transform_0, window_bounds = array<i64: 8, 4>}, {pipeline_mode = #tpu.pipeline_mode<synchronous>, transform_indices = @transform_1, window_bounds = array<i64: 5, 128>}, {pipeline_mode = #tpu.pipeline_mode<synchronous>, transform_indices = @transform_2, window_bounds = array<i64: 2, 128>}, {transform_indices = @transform_3, window_bounds = array<i64: 8, 1>}]} {
    %c0 = arith.constant 0 : index
    %c0_0 = arith.constant 0 : index
    %0 = vector.load %arg1[%c0, %c0_0] : memref<8x4xf32, #tpu.memory_space<vmem>>, vector<8x4xf32>
    %c4 = arith.constant 4 : index
    %c0_1 = arith.constant 0 : index
    %1 = vector.load %arg2[%c4, %c0_1] : memref<5x128xf32, #tpu.memory_space<vmem>>, vector<1x128xf32>
    %2 = vector.extract_strided_slice %0 {offsets = [0, 0], sizes = [8, 1], strides = [1, 1]} : vector<8x4xf32> to vector<8x1xf32>
    %c0_2 = arith.constant 0 : index
    %c0_3 = arith.constant 0 : index
    %3 = vector.load %arg2[%c0_2, %c0_3] : memref<5x128xf32, #tpu.memory_space<vmem>>, vector<1x128xf32>
    %4 = vector.broadcast %2 : vector<8x1xf32> to vector<8x128xf32>
    %5 = vector.broadcast %3 : vector<1x128xf32> to vector<8x128xf32>
    %6 = arith.mulf %4, %5 : vector<8x128xf32>
    %7 = vector.broadcast %1 : vector<1x128xf32> to vector<8x128xf32>
    %8 = arith.addf %7, %6 : vector<8x128xf32>
    %9 = vector.extract_strided_slice %0 {offsets = [0, 1], sizes = [8, 1], strides = [1, 1]} : vector<8x4xf32> to vector<8x1xf32>
    %c1 = arith.constant 1 : index
    %c0_4 = arith.constant 0 : index
    %10 = vector.load %arg2[%c1, %c0_4] : memref<5x128xf32, #tpu.memory_space<vmem>>, vector<1x128xf32>
    %11 = vector.broadcast %9 : vector<8x1xf32> to vector<8x128xf32>
    %12 = vector.broadcast %10 : vector<1x128xf32> to vector<8x128xf32>
    %13 = arith.mulf %11, %12 : vector<8x128xf32>
    %14 = arith.addf %8, %13 : vector<8x128xf32>
    %15 = vector.extract_strided_slice %0 {offsets = [0, 2], sizes = [8, 1], strides = [1, 1]} : vector<8x4xf32> to vector<8x1xf32>
    %c2 = arith.constant 2 : index
    %c0_5 = arith.constant 0 : index
    %16 = vector.load %arg2[%c2, %c0_5] : memref<5x128xf32, #tpu.memory_space<vmem>>, vector<1x128xf32>
    %17 = vector.broadcast %15 : vector<8x1xf32> to vector<8x128xf32>
    %18 = vector.broadcast %16 : vector<1x128xf32> to vector<8x128xf32>
    %19 = arith.mulf %17, %18 : vector<8x128xf32>
    %20 = arith.addf %14, %19 : vector<8x128xf32>
    %21 = vector.extract_strided_slice %0 {offsets = [0, 3], sizes = [8, 1], strides = [1, 1]} : vector<8x4xf32> to vector<8x1xf32>
    %c3 = arith.constant 3 : index
    %c0_6 = arith.constant 0 : index
    %22 = vector.load %arg2[%c3, %c0_6] : memref<5x128xf32, #tpu.memory_space<vmem>>, vector<1x128xf32>
    %23 = vector.broadcast %21 : vector<8x1xf32> to vector<8x128xf32>
    %24 = vector.broadcast %22 : vector<1x128xf32> to vector<8x128xf32>
    %25 = arith.mulf %23, %24 : vector<8x128xf32>
    %26 = arith.addf %20, %25 : vector<8x128xf32>
    %cst = arith.constant 0.000000e+00 : f32
    %27 = vector.broadcast %cst : f32 to vector<8x128xf32>
    %28 = arith.maximumf %26, %27 : vector<8x128xf32>
    %c0_7 = arith.constant 0 : index
    %c0_8 = arith.constant 0 : index
    %29 = vector.load %arg3[%c0_7, %c0_8] : memref<2x128xf32, #tpu.memory_space<vmem>>, vector<1x128xf32>
    %c1_9 = arith.constant 1 : index
    %c0_10 = arith.constant 0 : index
    %30 = vector.load %arg3[%c1_9, %c0_10] : memref<2x128xf32, #tpu.memory_space<vmem>>, vector<1x1xf32>
    %31 = vector.broadcast %29 : vector<1x128xf32> to vector<8x128xf32>
    %32 = arith.mulf %28, %31 : vector<8x128xf32>
    %cst_11 = arith.constant dense<0.000000e+00> : vector<8xf32>
    %33 = vector.multi_reduction <add>, %32, %cst_11 [1] : vector<8x128xf32> to vector<8xf32>
    %34 = vector.shape_cast %33 : vector<8xf32> to vector<8x1xf32>
    %35 = vector.broadcast %30 : vector<1x1xf32> to vector<8x1xf32>
    %36 = arith.addf %34, %35 : vector<8x1xf32>
    %c0_12 = arith.constant 0 : index
    %c0_13 = arith.constant 0 : index
    %37 = vector.load %arg4[%c0_12, %c0_13] : memref<8x1xf32, #tpu.memory_space<vmem>>, vector<8x1xf32>
    tpu.vector_store %arg4[%c0_12, %c0_13], %36 {strides = array<i32>} : memref<8x1xf32, #tpu.memory_space<vmem>>, vector<8x1xf32>,
    return
  }
  func.func @transform_0(%arg0: i32) -> (i32, i32) {
    %c0_i32 = arith.constant 0 : i32
    %c0_i32_0 = arith.constant 0 : i32
    return %arg0, %c0_i32 : i32, i32
  }
  func.func @transform_1(%arg0: i32) -> (i32, i32) {
    %c0_i32 = arith.constant 0 : i32
    %c0_i32_0 = arith.constant 0 : i32
    %c0_i32_1 = arith.constant 0 : i32
    return %c0_i32, %c0_i32_0 : i32, i32
  }
  func.func @transform_2(%arg0: i32) -> (i32, i32) {
    %c0_i32 = arith.constant 0 : i32
    %c0_i32_0 = arith.constant 0 : i32
    %c0_i32_1 = arith.constant 0 : i32
    return %c0_i32, %c0_i32_0 : i32, i32
  }
  func.func @transform_3(%arg0: i32) -> (i32, i32) {
    %c0_i32 = arith.constant 0 : i32
    %c0_i32_0 = arith.constant 0 : i32
    return %arg0, %c0_i32 : i32, i32
  }
}

</mosaic_0001>

<bundles_post_ra>
// kernel: tpu_custom_call.1
= control target key start
LH: loop header
LB: loop body
LE: loop exit
PB: predicated region body
PF: predicated region fallthrough
CT: control target
= control target key end

     0   :  { %v102_v0 = vmov 0   ;;  %v103_v2 = vmov 2   ;;  %v104_v3 = vmov 1   ;;  %v105_v4 = vmov 3   ;;  %s153_s0 = inlined_call_operand.vmem [shape: f32[8,4], index: 0, kind: input, shape index: {}]   ;;  %s154_s1 = inlined_call_operand.vmem [shape: f32[5,128], index: 1, kind: input, shape index: {}]   ;;  %s155_s2 = inlined_call_operand.vmem [shape: f32[2,128], index: 2, kind: input, shape index: {}]   ;;  %s156_s3 = inlined_call_operand.vmem [shape: f32[8,1], index: 3, kind: output, shape index: {}]  }
   0x1   :  { %97 = vset.pattern.permute.xlu0 %v102_v0  ;;  %v14_v1 = vld [vmem:[%s153_s0] sm:$0xff]  ;;  %99 = vset.pattern.permute.xlu1 %v103_v2  ;;  %vm80_vm0 = vcmask 7168  }
   0x2   :  { %19 = vperm.xlu0 %97, %v14_v1   ;;  %45 = vperm.xlu1 %99, %v14_v1   ;;  %v86_v5 = vld [vmem:[%s154_s1] ss:$0 sm:$0xff]  ;;  %v87_v9 = vld [vmem:[%s154_s1 + $0x4] ss:$0 sm:$0xff]  ;;  %v88_v10 = vld [vmem:[%s154_s1 + $0x1] ss:$0 sm:$0xff] }
   0x3   :  { %v89_v11 = vld [vmem:[%s154_s1 + $0x2] ss:$0 sm:$0xff]  ;;  %v90_v13 = vld [vmem:[%s154_s1 + $0x3] ss:$0 sm:$0xff]  ;;  %v91_v22 = vld [vmem:[%s155_s2] ss:$0 sm:$0xff] }
   0x4   :  { %v92_v25 = vld [vmem:[%s155_s2 + $0x1] ss:$0 sm:$0xff] }
   0x6   :  { %98 = vset.pattern.permute.xlu0 %v104_v3  ;;  %100 = vset.pattern.permute.xlu1 %v105_v4 }
   0x7   :  { %34 = vperm.xlu0 %98, %v14_v1   ;;  %56 = vperm.xlu1 %100, %v14_v1  }
   0xb   :  { %101 = vset.pattern.permute.xlu0 %v105_v4 }
  0x81   :  { %v20_v6 = vpop.permute.xlu0 %19  ;;  %v46_v7 = vpop.permute.xlu1 %45 }
  0x82   :  { %v26_v8 = vmul.f32 %v86_v5, %v20_v6  ;;  %v52_v17 = vmul.f32 %v89_v11, %v46_v7 }
  0x84   :  { %v31_v15 = vadd.f32 %v87_v9, %v26_v8 }
  0x86   :  { %v35_v12 = vpop.permute.xlu0 %34  ;;  %v57_v14 = vpop.permute.xlu1 %56 }
  0x87   :  { %v41_v16 = vmul.f32 %v88_v10, %v35_v12  ;;  %v63_v19 = vmul.f32 %v90_v13, %v57_v14 }
  0x89   :  { %v42_v18 = vadd.f32 %v41_v16, %v31_v15 }
  0x8b   :  { %v53_v20 = vadd.f32 %v52_v17, %v42_v18 }
  0x8d   :  { %v64_v21 = vadd.f32 %v63_v19, %v53_v20 }
  0x8f   :  { %v65_v23 = vmax.f32 %v64_v21, 0.0 }
  0x91   :  { %v72_v24 = vmul.f32 %v91_v22, %v65_v23 }
  0x93   :  { %73 = vadd.xlane.f32.xlu1 %v72_v24 }
 0x120   :  { %v74_v26 = vpop.xlane.xlu1 %73 }
 0x121   :  { %v79_v27 = vadd.f32 %v92_v25, %v74_v26 }
 0x123   :  { %81 = vst.msk [vmem:[%s156_s3] sm:$0xff] %vm80_vm0, %v79_v27 }

</bundles_post_ra>
